<compile_context>
chip_gen: v7x
topology: tpu7x:2x2x1
jax: 0.10.0
libtpu: 0.0.40
codegen_flags: <defaults>
</compile_context>

<pallas_src>
import functools

import jax
import jax.numpy as jnp
from jax.experimental import pallas as pl
from jax.experimental.pallas import tpu as pltpu


def _round_up(x: int, m: int) -> int:
    return (x + m - 1) // m * m


def linear_kernel(x_ref, w_ref, b_ref, o_ref, acc_ref):
    """One (tm, tn) output tile; accumulates over the K grid axis.

    x_ref: [tm, tk]   activation tile
    w_ref: [tn, tk]   weight tile in PyTorch layout (latent-major) -> trans_b
    b_ref: [1, tn]    bias tile
    o_ref: [tm, tn]   output tile
    acc_ref: [tm, tn] f32 VMEM accumulator (persists across K iterations)
    """
    k = pl.program_id(2)

    @pl.when(k == 0)
    def _():
        acc_ref[...] = jnp.zeros_like(acc_ref)

    # Contract last dim of x with last dim of w (i.e. x @ w.T) on the MXU,
    # accumulating in f32.
    acc_ref[...] += jax.lax.dot_general(
        x_ref[...], w_ref[...],
        dimension_numbers=(((1,), (1,)), ((), ())),
        preferred_element_type=jnp.float32)

    @pl.when(k == pl.num_programs(2) - 1)
    def _():
        # Bias added exactly once, in the finalize step.
        o_ref[...] = (acc_ref[...] + b_ref[...]).astype(o_ref.dtype)


@functools.partial(jax.jit, static_argnames=("tm", "tn", "tk"))
def net_forward(x, weight, bias, *, tm=256, tn=256, tk=512):
    """Pallas implementation of Net.forward: nn.Linear(input_size, latent_size).

    x:      [B, input_size]          float32 (or bf16)
    weight: [latent_size, input_size] (PyTorch convention, NOT transposed)
    bias:   [latent_size]
    returns [B, latent_size]
    """
    B, in_dim = x.shape
    latent = weight.shape[0]

    # Pick tiles: use the preferred MXU-aligned tile when the (aligned) dim is
    # large enough, otherwise use the whole padded dim as a single block.
    def pick(dim, pref, align):
        padded = _round_up(dim, align)
        return pref if padded >= pref else padded

    tm = pick(B, tm, 8)        # sublane-aligned
    tn = pick(latent, tn, 128)  # lane-aligned -> lane-dense output stores
    tk = pick(in_dim, tk, 128)  # lane-aligned

    Mp = _round_up(B, tm)
    Np = _round_up(latent, tn)
    Kp = _round_up(in_dim, tk)

    # Zero-pad to tile multiples (zeros in K contribute nothing to the dot;
    # extra M rows / N cols are sliced off afterwards).
    if (Mp, Kp) != (B, in_dim):
        x = jnp.pad(x, ((0, Mp - B), (0, Kp - in_dim)))
    if (Np, Kp) != (latent, in_dim):
        weight = jnp.pad(weight, ((0, Np - latent), (0, Kp - in_dim)))
    b2d = bias.reshape(1, latent)
    if Np != latent:
        b2d = jnp.pad(b2d, ((0, 0), (0, Np - latent)))

    grid = (Mp // tm, Np // tn, Kp // tk)

    out_padded = pl.pallas_call(
        linear_kernel,
        out_shape=jax.ShapeDtypeStruct((Mp, Np), x.dtype),
        grid_spec=pltpu.PrefetchScalarGridSpec(
            num_scalar_prefetch=0,
            grid=grid,
            in_specs=[
                pl.BlockSpec((tm, tk), lambda i, j, k: (i, k)),   # x tile
                pl.BlockSpec((tn, tk), lambda i, j, k: (j, k)),   # weight tile
                pl.BlockSpec((1, tn), lambda i, j, k: (0, j)),    # bias tile
            ],
            out_specs=pl.BlockSpec((tm, tn), lambda i, j, k: (i, j)),
            scratch_shapes=[pltpu.VMEM((tm, tn), jnp.float32)],
        ),
        compiler_params=pltpu.CompilerParams(
            dimension_semantics=("parallel", "parallel", "arbitrary"),
            vmem_limit_bytes=64 << 20,
        ),
    )(x, weight, b2d)

    # Slice padding back off (glue).
    return out_padded[:B, :latent]


if __name__ == "__main__":
    # Small shapes implied by Net(input_size, latent_size)
    batch, input_size, latent_size = 8, 32, 16

    key = jax.random.PRNGKey(0)
    kx, kw, kb = jax.random.split(key, 3)

    x = jax.random.normal(kx, (batch, input_size), dtype=jnp.float32)
    # PyTorch Linear default init: U(-1/sqrt(in), 1/sqrt(in))
    bound = 1.0 / jnp.sqrt(jnp.float32(input_size))
    weight = jax.random.uniform(kw, (latent_size, input_size),
                                minval=-bound, maxval=bound, dtype=jnp.float32)
    bias = jax.random.uniform(kb, (latent_size,),
                              minval=-bound, maxval=bound, dtype=jnp.float32)

    out = net_forward(x, weight, bias)
    jax.block_until_ready(out)

    # Reference check in plain JAX
    ref = x @ weight.T + bias
    assert out.shape == (batch, latent_size)
    assert jnp.allclose(out, ref, atol=1e-5, rtol=1e-5)

    # Also exercise a larger, tile-spanning shape to validate the K-reduction
    # grid, bias finalize, and padding/slicing logic.
    B2, in2, lat2 = 512, 1024, 384
    k2x, k2w, k2b = jax.random.split(jax.random.PRNGKey(1), 3)
    x2 = jax.random.normal(k2x, (B2, in2), dtype=jnp.float32)
    w2 = jax.random.normal(k2w, (lat2, in2), dtype=jnp.float32) * 0.02
    b2 = jax.random.normal(k2b, (lat2,), dtype=jnp.float32)
    out2 = net_forward(x2, w2, b2)
    jax.block_until_ready(out2)
    ref2 = x2 @ w2.T + b2
    assert out2.shape == (B2, lat2)
    assert jnp.allclose(out2, ref2, atol=1e-3, rtol=1e-3)

    print("KERNEL_OK")
</pallas_src>

<mosaic_0001>
module attributes {stable_mosaic.version = 11 : i64} {
  func.func @linear_kernel(%arg0: i32, %arg1: i32, %arg2: i32, %arg3: memref<8x128xf32, #tpu.memory_space<vmem>>, %arg4: memref<128x128xf32, #tpu.memory_space<vmem>>, %arg5: memref<1x128xf32, #tpu.memory_space<vmem>>, %arg6: memref<8x128xf32, #tpu.memory_space<vmem>>, %arg7: memref<8x128xf32, #tpu.memory_space<vmem>>) attributes {dimension_semantics = [#tpu.dimension_semantics<parallel>, #tpu.dimension_semantics<parallel>, #tpu.dimension_semantics<arbitrary>], iteration_bounds = array<i64: 1, 1, 1>, scalar_prefetch = 0 : i64, scratch_operands = 1 : i64, tpu.core_type = #tpu.core_type<tc>, window_params = [{transform_indices = @transform_0, window_bounds = array<i64: 8, 128>}, {transform_indices = @transform_1, window_bounds = array<i64: 128, 128>}, {transform_indices = @transform_2, window_bounds = array<i64: 1, 128>}, {transform_indices = @transform_3, window_bounds = array<i64: 8, 128>}]} {
    %c0_i32 = arith.constant 0 : i32
    %0 = arith.cmpi eq, %arg2, %c0_i32 : i32
    %1 = arith.extui %0 : i1 to i32
    %c0_i32_0 = arith.constant 0 : i32
    %2 = arith.cmpi ne, %1, %c0_i32_0 : i32
    scf.if %2 {
      %cst_10 = arith.constant 0.000000e+00 : f32
      %12 = vector.broadcast %cst_10 : f32 to vector<8x128xf32>
      %c0_11 = arith.constant 0 : index
      %c0_12 = arith.constant 0 : index
      %13 = vector.load %arg7[%c0_11, %c0_12] : memref<8x128xf32, #tpu.memory_space<vmem>>, vector<8x128xf32>
      tpu.vector_store %arg7[%c0_11, %c0_12], %12 {strides = array<i32>} : memref<8x128xf32, #tpu.memory_space<vmem>>, vector<8x128xf32>,
    } else {
    }
    %c0 = arith.constant 0 : index
    %c0_1 = arith.constant 0 : index
    %3 = vector.load %arg7[%c0, %c0_1] : memref<8x128xf32, #tpu.memory_space<vmem>>, vector<8x128xf32>
    %c0_2 = arith.constant 0 : index
    %c0_3 = arith.constant 0 : index
    %4 = vector.load %arg3[%c0_2, %c0_3] : memref<8x128xf32, #tpu.memory_space<vmem>>, vector<8x128xf32>
    %c0_4 = arith.constant 0 : index
    %c0_5 = arith.constant 0 : index
    %5 = vector.load %arg4[%c0_4, %c0_5] : memref<128x128xf32, #tpu.memory_space<vmem>>, vector<128x128xf32>
    %cst = arith.constant dense<0.000000e+00> : vector<8x128xf32>
    %6 = tpu.matmul %4, %5, %cst {dimension_numbers = #tpu.dot_dimension_numbers<[1], [1], [0], [0], [0, 0, 1, 0], [], []>} : vector<8x128xf32>, vector<128x128xf32>, vector<8x128xf32> -> vector<8x128xf32>
    %7 = arith.addf %3, %6 : vector<8x128xf32>
    %c0_6 = arith.constant 0 : index
    %c0_7 = arith.constant 0 : index
    %8 = vector.load %arg7[%c0_6, %c0_7] : memref<8x128xf32, #tpu.memory_space<vmem>>, vector<8x128xf32>
    tpu.vector_store %arg7[%c0_6, %c0_7], %7 {strides = array<i32>} : memref<8x128xf32, #tpu.memory_space<vmem>>, vector<8x128xf32>,
    %c0_i32_8 = arith.constant 0 : i32
    %9 = arith.cmpi eq, %arg2, %c0_i32_8 : i32
    %10 = arith.extui %9 : i1 to i32
    %c0_i32_9 = arith.constant 0 : i32
    %11 = arith.cmpi ne, %10, %c0_i32_9 : i32
    scf.if %11 {
      %c0_10 = arith.constant 0 : index
      %c0_11 = arith.constant 0 : index
      %12 = vector.load %arg7[%c0_10, %c0_11] : memref<8x128xf32, #tpu.memory_space<vmem>>, vector<8x128xf32>
      %c0_12 = arith.constant 0 : index
      %c0_13 = arith.constant 0 : index
      %13 = vector.load %arg5[%c0_12, %c0_13] : memref<1x128xf32, #tpu.memory_space<vmem>>, vector<1x128xf32>
      %14 = vector.broadcast %13 : vector<1x128xf32> to vector<8x128xf32>
      %15 = arith.addf %12, %14 : vector<8x128xf32>
      %c0_14 = arith.constant 0 : index
      %c0_15 = arith.constant 0 : index
      %16 = vector.load %arg6[%c0_14, %c0_15] : memref<8x128xf32, #tpu.memory_space<vmem>>, vector<8x128xf32>
      tpu.vector_store %arg6[%c0_14, %c0_15], %15 {strides = array<i32>} : memref<8x128xf32, #tpu.memory_space<vmem>>, vector<8x128xf32>,
    } else {
    }
    return
  }
  func.func @transform_0(%arg0: i32, %arg1: i32, %arg2: i32) -> (i32, i32) {
    %c0_i32 = arith.constant 0 : i32
    return %arg0, %arg2 : i32, i32
  }
  func.func @transform_1(%arg0: i32, %arg1: i32, %arg2: i32) -> (i32, i32) {
    %c0_i32 = arith.constant 0 : i32
    return %arg1, %arg2 : i32, i32
  }
  func.func @transform_2(%arg0: i32, %arg1: i32, %arg2: i32) -> (i32, i32) {
    %c0_i32 = arith.constant 0 : i32
    %c0_i32_0 = arith.constant 0 : i32
    return %c0_i32, %arg1 : i32, i32
  }
  func.func @transform_3(%arg0: i32, %arg1: i32, %arg2: i32) -> (i32, i32) {
    %c0_i32 = arith.constant 0 : i32
    return %arg0, %arg1 : i32, i32
  }
}

</mosaic_0001>

<bundles_post_ra>
// kernel: net_forward.1
= control target key start
LH: loop header
LB: loop body
LE: loop exit
PB: predicated region body
PF: predicated region fallthrough
CT: control target
= control target key end

     0   :  { %8 = vsyncpa [#allocation4], 0  ;;  %s433_s0 = inlined_call_operand.hbm [shape: f32[8,128], index: 0, kind: input, shape index: {}]   ;;  %s434_s1 = inlined_call_operand.hbm [shape: f32[128,128], index: 1, kind: input, shape index: {}]   ;;  %s435_s2 = inlined_call_operand.hbm [shape: f32[1,128], index: 2, kind: input, shape index: {}]   ;;  %s436_s3 = inlined_call_operand.hbm [shape: f32[8,128], index: 3, kind: output, shape index: {}]  }
   0x1   :  { %9 = vsyncpa [#allocation7], 0 }
   0x2   :  { %10 = vsyncpa [#allocation5], 0  ;;  %s356_s12 = smov [#allocation6]   ;;  %s262_s16 = scalar_lea.hbm %s434_s1, 2048 }
   0x3   :  { %s26_s13 = sshll.u32 %s356_s12, 4  ;;  %p263_p0 = scmp.ne.s32.totalorder %s434_s1, %s262_s16  ;;  %s27_s13 = int_to_ptr.vmem [resolvable:$true] %s26_s13 }
   0x4   :  { %p266_p1 = scmp.lt.u32.totalorder %s262_s16, %s434_s1 }
   0x6   :  { %p268_p2 = pnand %p266_p1, %p263_p0 }
   0x8   :  { %271 = shalt.err (!%p268_p2)
}
   0x9   :  { %s272_s21 = scalar_lea.vmem %s27_s13, 2048  ;;  %p277_p4 = scmp.lt.s32.totalorder %s27_s13, %s27_s13 }
   0xa   :  { %p273_p3 = scmp.ne.s32.totalorder %s27_s13, %s272_s21  ;;  %p278_p5 = scmp.lt.s32.totalorder %s272_s21, %s272_s21 }
   0xc   :  { %p279_p6 = por %p278_p5, %p277_p4 }
   0xe   :  { %p280_p7 = pnand %p279_p6, %p273_p3 }
  0x10   :  { %283 = shalt.err (!%p280_p7)
}
  0x11   :  { %s357_s22 = smov 128   ;;  %s358_s23 = smov 8  }
  0x12   :  { %32 = dma.hbm_to_vmem [thread:$0]  %s434_s1, 2048, %s27_s13, [#allocation7], %s357_s22, %s357_s22, %s358_s23  }
  0x13   :  { %s359_s26 = smov [#allocation3]   ;;  %s360_s28 = smov [#allocation8]  }
  0x14   :  { %s17_s27 = sshll.u32 %s359_s26, 4  ;;  %s39_s29 = sshll.u32 %s360_s28, 4  ;;  %s18_s27 = int_to_ptr.vmem [resolvable:$true] %s17_s27  ;;  %s40_s29 = int_to_ptr.vmem [resolvable:$true] %s39_s29 }
  0x15   :  { %s284_s5 = scalar_lea.hbm %s433_s0, 128 }
  0x16   :  { %p285_p8 = scmp.ne.s32.totalorder %s433_s0, %s284_s5  ;;  %p288_p9 = scmp.lt.u32.totalorder %s284_s5, %s433_s0 }
  0x18   :  { %p290_p10 = pnand %p288_p9, %p285_p8 }
  0x1a   :  { %293 = shalt.err (!%p290_p10)
}
  0x1b   :  { %s294_s1 = scalar_lea.vmem %s18_s27, 128  ;;  %p299_p12 = scmp.lt.s32.totalorder %s18_s27, %s18_s27 }
  0x1c   :  { %p295_p11 = scmp.ne.s32.totalorder %s18_s27, %s294_s1  ;;  %p300_p13 = scmp.lt.s32.totalorder %s294_s1, %s294_s1 }
  0x1e   :  { %p301_p0 = por %p300_p13, %p299_p12 }
  0x20   :  { %p302_p1 = pnand %p301_p0, %p295_p11 }
  0x22   :  { %305 = shalt.err (!%p302_p1)
}
  0x23   :  { %20 = dma.hbm_to_vmem [thread:$0]  %s433_s0, 128, %s18_s27, [#allocation4]  }
  0x24   :  { %s306_s14 = scalar_lea.hbm %s435_s2, 16 }
  0x25   :  { %p307_p2 = scmp.ne.s32.totalorder %s435_s2, %s306_s14  ;;  %p310_p3 = scmp.lt.u32.totalorder %s306_s14, %s435_s2 }
  0x27   :  { %p312_p4 = pnand %p310_p3, %p307_p2 }
  0x29   :  { %315 = shalt.err (!%p312_p4)
}
  0x2a   :  { %s316_s19 = scalar_lea.vmem %s40_s29, 16  ;;  %s320_s20 = scalar_lea.vmem %s40_s29, 32 }
  0x2b   :  { %p317_p5 = scmp.ne.s32.totalorder %s40_s29, %s316_s19  ;;  %p321_p6 = scmp.lt.s32.totalorder %s40_s29, %s40_s29 }
  0x2c   :  { %p322_p7 = scmp.lt.s32.totalorder %s320_s20, %s316_s19 }
  0x2e   :  { %p323_p8 = por %p322_p7, %p321_p6 }
  0x30   :  { %p324_p9 = pnand %p323_p8, %p317_p5 }
  0x32   :  { %327 = shalt.err (!%p324_p9)
}
  0x33   :  { %42 = dma.hbm_to_vmem [thread:$0]  %s435_s2, 16, %s40_s29, [#allocation7]  }
  0x34   :  { %350 = dma.done.wait [#allocation4], 128  }
  0x35   :  { %351 = vsyncadd [#allocation4], 4294967168 }
  0x36   :  { %352 = dma.done.wait [#allocation7], 2064  }
  0x37   :  { %353 = vsyncadd [#allocation7], 4294965232  ;;  %v361_v0 = vmov 0.0|0.0   ;;  %vm362_vm0 = vmmov 0   ;;  %v363_v1 = vmov 0.0   ;;  %v59_v2 = vld [vmem:[#allocation6] sm:$0xff] }
  0x38   :  { %229 = vmatprep.subr.bf16.mxu0 %v361_v0  ;;  %226 = vmatprep.mubr.msk.f32.mxu0 %vm362_vm0, %v363_v1  ;;  %v60_v3 = vld [vmem:[#allocation6 + $0x8] sm:$0xff]  ;;  %v61_v5 = vld [vmem:[#allocation6 + $0x10] sm:$0xff]  ;;  %v62_v6 = vld [vmem:[#allocation6 + $0x18] sm:$0xff]  ;;  %s364_s2 = smov [#allocation9]  }
  0x39   :  { %v230_v4 = vpack.c.bf16 %v60_v3, %v59_v2  ;;  %v233_v7 = vpack.c.bf16 %v62_v6, %v61_v5  ;;  %v63_v8 = vld [vmem:[#allocation6 + $0x20] sm:$0xff]  ;;  %v64_v9 = vld [vmem:[#allocation6 + $0x28] sm:$0xff]  ;;  %v65_v11 = vld [vmem:[#allocation6 + $0x30] sm:$0xff]  ;;  %s166_s22 = sshll.u32 %s364_s2, 4  ;;  %s167_s22 = int_to_ptr.vmem [resolvable:$true] %s166_s22 }
  0x3a   :  { %v236_v10 = vpack.c.bf16 %v64_v9, %v63_v8  ;;  %v66_v12 = vld [vmem:[#allocation6 + $0x38] sm:$0xff]  ;;  %v67_v14 = vld [vmem:[#allocation6 + $0x40] sm:$0xff]  ;;  %v68_v15 = vld [vmem:[#allocation6 + $0x48] sm:$0xff]  ;;  %s328_s23 = scalar_lea.vmem %s167_s22, 128  ;;  %p333_p11 = scmp.lt.s32.totalorder %s167_s22, %s167_s22 }
  0x3b   :  { %231 = vmatpush3.bf16.xpose.msra.mxu0 %v230_v4  ;;  %v239_v13 = vpack.c.bf16 %v66_v12, %v65_v11  ;;  %v242_v16 = vpack.c.bf16 %v68_v15, %v67_v14  ;;  %v69_v17 = vld [vmem:[#allocation6 + $0x50] sm:$0xff]  ;;  %v70_v18 = vld [vmem:[#allocation6 + $0x58] sm:$0xff]  ;;  %v71_v20 = vld [vmem:[#allocation6 + $0x60] sm:$0xff]  ;;  %p329_p10 = scmp.ne.s32.totalorder %s167_s22, %s328_s23  ;;  %p334_p12 = scmp.lt.s32.totalorder %s328_s23, %s328_s23 }
  0x3c   :  { %232 = vmatprep.subr.bf16.mxu0 %v361_v0  ;;  %v245_v19 = vpack.c.bf16 %v70_v18, %v69_v17  ;;  %v72_v21 = vld [vmem:[#allocation6 + $0x68] sm:$0xff]  ;;  %v73_v23 = vld [vmem:[#allocation6 + $0x70] sm:$0xff]  ;;  %v74_v24 = vld [vmem:[#allocation6 + $0x78] sm:$0xff] }
  0x3d   :  { %v248_v22 = vpack.c.bf16 %v72_v21, %v71_v20  ;;  %v251_v25 = vpack.c.bf16 %v74_v24, %v73_v23  ;;  %v58_v26 = vld [vmem:[#allocation3] sm:$0xff]  ;;  %v176_v27 = vld [vmem:[#allocation8] ss:$0 sm:$0xff]  ;;  %p335_p13 = por %p334_p12, %p333_p11 }
  0x3f   :  { %p336_p0 = pnand %p335_p13, %p329_p10 }
  0x43   :  { %234 = vmatpush3.bf16.xpose.msra.mxu0 %v233_v7 }
  0x44   :  { %235 = vmatprep.subr.bf16.mxu0 %v361_v0 }
  0x4b   :  { %237 = vmatpush3.bf16.xpose.msra.mxu0 %v236_v10 }
  0x4c   :  { %238 = vmatprep.subr.bf16.mxu0 %v361_v0 }
  0x53   :  { %240 = vmatpush3.bf16.xpose.msra.mxu0 %v239_v13 }
  0x54   :  { %241 = vmatprep.subr.bf16.mxu0 %v361_v0 }
  0x5b   :  { %243 = vmatpush3.bf16.xpose.msra.mxu0 %v242_v16 }
  0x5c   :  { %244 = vmatprep.subr.bf16.mxu0 %v361_v0 }
  0x63   :  { %246 = vmatpush3.bf16.xpose.msra.mxu0 %v245_v19 }
  0x64   :  { %247 = vmatprep.subr.bf16.mxu0 %v361_v0 }
  0x6b   :  { %249 = vmatpush3.bf16.xpose.msra.mxu0 %v248_v22 }
  0x6c   :  { %250 = vmatprep.subr.bf16.mxu0 %v361_v0 }
  0x73   :  { %252 = vmatpush3.bf16.xpose.msra.mxu0 %v251_v25 }
  0x7a   :  { %227 = vmatmul.mubr.f32.vlgmr.msra.gmra.mrb[0].mxu0 %v58_v26 }
 0x14d   :  { %v141_v28 = vpop.f32.mrb[0].mxu0 }
 0x14e   :  { %v158_v29 = vadd.f32 %v176_v27, %v141_v28  ;;  %v228_v30 = vpop.f32.mrb[1].mxu0 }
 0x150   :  { %159 = vst [vmem:[#allocation9] sm:$0xff] %v158_v29 }
 0x151   :  { %339 = shalt.err (!%p336_p0)
}
 0x152   :  { %s340_s26 = scalar_lea.hbm %s436_s3, 128 }
 0x153   :  { %p341_p1 = scmp.ne.s32.totalorder %s436_s3, %s340_s26  ;;  %p344_p2 = scmp.lt.u32.totalorder %s340_s26, %s436_s3 }
 0x155   :  { %p346_p3 = pnand %p344_p2, %p341_p1 }
 0x157   :  { %349 = shalt.err (!%p346_p3)
}
 0x158   :  { %169 = dma.vmem_to_hbm [thread:$0]  %s167_s22, 128, %s436_s3, [#allocation5]  }
 0x159   :  { %354 = dma.done.wait [#allocation5], 128  }
 0x15a   :  { %355 = vsyncadd [#allocation5], 4294967168 }
 0x15b   :  { %173 = vsyncpa [#allocation4], 1 }
 0x15c   :  { %174 = vsyncpa [#allocation7], 1 }
 0x15d   :  { %175 = vsyncpa [#allocation5], 1 }

</bundles_post_ra>
